<compile_context>
chip_gen: v7x
topology: tpu7x:2x2x1
jax: 0.10.0
libtpu: 0.0.40
codegen_flags: <defaults>
</compile_context>

<pallas_src>
import jax
import jax.numpy as jnp
from jax.experimental import pallas as pl
from jax.experimental.pallas import tpu as pltpu

NU = 16            # user nodes
NM = 16            # movie nodes
N = NU + NM        # total graph nodes
USER_FEAT = 10     # user_features.shape[1]
MOVIE_FEAT = 12    # movie_features.shape[1]
CAT_FEAT = USER_FEAT + MOVIE_FEAT
IN_CH = 16         # in_channels
HID_CH = 32        # hidden_channels
OUT_CH = 8         # out_channels
OUT_PAD = 128      # lane-dense padded width (slab lanes & output lanes)
BN_EPS = 1e-5

# Row layout of the packed parameter slab (SLAB_ROWS, OUT_PAD), f32.
ROW_WF = 0                      # rows  0..21 , cols 0:HID_CH : Wf (CAT_FEAT, HID_CH)
ROW_BF = 24                     # rows 24..55 , cols 0:HID_CH : Bf (N, HID_CH)
ROW_WC2 = 56                    # rows 56..87 , cols 0:OUT_PAD: Wc2 zero-padded
ROW_GAMMA = 88                  # row  88     , cols 0:HID_CH : BN gamma
ROW_BETA = 89                   # row  89     , cols 0:HID_CH : BN beta
ROW_BC2 = 90                    # row  90     , cols 0:OUT_PAD: bc2 zero-padded
SLAB_ROWS = 96


def gnn_kernel(zin_ref, a_ref, slab_ref, o_ref):
    gpb = zin_ref.shape[0]                                   # graphs in this block

    # Static slices of the one packed parameter slab (single DMA for all params).
    wf = slab_ref[ROW_WF:ROW_WF + CAT_FEAT, :HID_CH]         # (22, 32)
    bf = slab_ref[ROW_BF:ROW_BF + N, :HID_CH]                # (32, 32)
    wc2 = slab_ref[ROW_WC2:ROW_WC2 + HID_CH, :]              # (32, 128)
    gamma = slab_ref[ROW_GAMMA:ROW_GAMMA + 1, :HID_CH]       # (1, 32)
    beta = slab_ref[ROW_BETA:ROW_BETA + 1, :HID_CH]          # (1, 32)
    bc2 = slab_ref[ROW_BC2:ROW_BC2 + 1, :]                   # (1, 128)

    a = a_ref[...]                                           # (gpb, N, N)

    # conv1 with fc1/fc2 folded in:  h = A_hat @ (Z_in @ Wf + Bf)
    # (bc1 intentionally omitted: cancelled exactly by train-mode BN mean subtraction.)
    zin2 = zin_ref[...].reshape(gpb * N, CAT_FEAT)           # stack graphs -> big M
    zw = jnp.dot(zin2, wf, preferred_element_type=jnp.float32)
    zw = zw.reshape(gpb, N, HID_CH) + bf                     # Bf broadcasts per graph
    h = jnp.einsum('gij,gjk->gik', a, zw,
                   preferred_element_type=jnp.float32)       # (gpb, N, HID_CH)

    # BatchNorm1d (training mode: per-graph batch statistics, biased variance).
    # Two-pass variance for numerical robustness.
    mean = jnp.mean(h, axis=1, keepdims=True)                # (gpb, 1, HID_CH)
    d = h - mean
    var = jnp.mean(d * d, axis=1, keepdims=True)
    h = d * jax.lax.rsqrt(var + BN_EPS) * gamma + beta

    # ReLU
    h = jnp.maximum(h, 0.0)

    # conv2: A_hat @ (H @ Wc2_pad) + bc2_pad  -> lane-dense (gpb, N, 128) store.
    hw = jnp.dot(h.reshape(gpb * N, HID_CH), wc2,
                 preferred_element_type=jnp.float32).reshape(gpb, N, OUT_PAD)
    o_ref[...] = jnp.einsum('gij,gjk->gik', a, hw,
                            preferred_element_type=jnp.float32) + bc2


def prepare_param_slab(params):
    """One-time host-side fold/pad/pack of every parameter-derived constant."""
    w_cat = jnp.concatenate([params["w1"], params["w2"]], axis=0)          # (22, 16)
    b_cat = jnp.concatenate(
        [jnp.broadcast_to(params["b1"], (NU, IN_CH)),
         jnp.broadcast_to(params["b2"], (NM, IN_CH))], axis=0)             # (32, 16)
    wf = w_cat @ params["wc1"]                                             # (22, 32)
    bf = b_cat @ params["wc1"]                                             # (32, 32)
    # NOTE: params["bc1"] is intentionally NOT folded in -- it is exactly cancelled
    # by the training-mode BatchNorm that follows. Re-add it here for eval-mode BN.
    slab = jnp.zeros((SLAB_ROWS, OUT_PAD), jnp.float32)
    slab = slab.at[ROW_WF:ROW_WF + CAT_FEAT, :HID_CH].set(wf)
    slab = slab.at[ROW_BF:ROW_BF + N, :HID_CH].set(bf)
    slab = slab.at[ROW_WC2:ROW_WC2 + HID_CH, :OUT_CH].set(params["wc2"])
    slab = slab.at[ROW_GAMMA, :HID_CH].set(params["gamma"].reshape(-1))
    slab = slab.at[ROW_BETA, :HID_CH].set(params["beta"].reshape(-1))
    slab = slab.at[ROW_BC2, :OUT_CH].set(params["bc2"].reshape(-1))
    return slab


def build_z_in(x, y):
    """Fused pad+concat building the block-diagonal fc input (single XLA concat)."""
    pad_x = [(0, 0)] * (x.ndim - 1) + [(0, MOVIE_FEAT)]
    pad_y = [(0, 0)] * (y.ndim - 1) + [(USER_FEAT, 0)]
    return jnp.concatenate([jnp.pad(x, pad_x), jnp.pad(y, pad_y)], axis=-2)


def gnn_forward_batched(z_in, a_hat, param_slab, graphs_per_block=1):
    """z_in: (G, N, CAT_FEAT), a_hat: (G, N, N) -> (G, N, OUT_CH)."""
    G = z_in.shape[0]
    gpb = graphs_per_block
    assert G % gpb == 0, "G must be divisible by graphs_per_block"
    grid = (G // gpb,)
    out_padded = pl.pallas_call(
        gnn_kernel,
        out_shape=jax.ShapeDtypeStruct((G, N, OUT_PAD), jnp.float32),
        grid_spec=pltpu.PrefetchScalarGridSpec(
            num_scalar_prefetch=0,
            grid=grid,
            in_specs=[
                pl.BlockSpec((gpb, N, CAT_FEAT), lambda g: (g, 0, 0)),
                pl.BlockSpec((gpb, N, N), lambda g: (g, 0, 0)),
                pl.BlockSpec((SLAB_ROWS, OUT_PAD), lambda g: (0, 0)),  # pinned params
            ],
            out_specs=pl.BlockSpec((gpb, N, OUT_PAD), lambda g: (g, 0, 0)),
        ),
        compiler_params=pltpu.CompilerParams(
            dimension_semantics=("parallel",)),   # v7x: shard graphs across both TCs
    )(z_in, a_hat, param_slab)
    return out_padded[..., :OUT_CH]


def gnn_forward(x, y, a_hat, param_slab):
    """Single-graph forward matching the original module signature."""
    z_in = build_z_in(x, y)[None]                 # (1, N, CAT_FEAT)
    return gnn_forward_batched(z_in, a_hat[None], param_slab)[0]


def build_norm_adj(edge_index, num_nodes):
    """Dense D^-1/2 (A + I) D^-1/2 with A[dst, src] = edge weight (PyG gcn_norm)."""
    src, dst = edge_index[0], edge_index[1]
    a = jnp.zeros((num_nodes, num_nodes), jnp.float32)
    a = a.at[dst, src].add(1.0)
    a = a + jnp.eye(num_nodes, dtype=jnp.float32)
    deg = a.sum(axis=1)
    dinv = jnp.where(deg > 0, jax.lax.rsqrt(deg), 0.0)
    return dinv[:, None] * a * dinv[None, :]


if __name__ == "__main__":
    key = jax.random.PRNGKey(0)
    ks = jax.random.split(key, 12)

    # node feature inputs (one graph)
    x = jax.random.normal(ks[0], (NU, USER_FEAT), dtype=jnp.float32)
    y = jax.random.normal(ks[1], (NM, MOVIE_FEAT), dtype=jnp.float32)

    # deterministic bipartite edge_index (both directions, like an undirected graph)
    u = jnp.arange(NU, dtype=jnp.int32)
    m = NU + (u * 3) % NM
    edge_index = jnp.stack([jnp.concatenate([u, m]),
                            jnp.concatenate([m, u])])
    a_hat = build_norm_adj(edge_index, N)

    def init(k, shape, scale=0.1):
        return scale * jax.random.normal(k, shape, dtype=jnp.float32)

    params = {
        "w1": init(ks[2], (USER_FEAT, IN_CH)),
        "b1": init(ks[3], (1, IN_CH)),
        "w2": init(ks[4], (MOVIE_FEAT, IN_CH)),
        "b2": init(ks[5], (1, IN_CH)),
        "wc1": init(ks[6], (IN_CH, HID_CH)),
        "bc1": init(ks[7], (1, HID_CH)),   # unused: cancelled by train-mode BN
        "wc2": init(ks[8], (HID_CH, OUT_CH)),
        "bc2": init(ks[9], (1, OUT_CH)),
        "gamma": jnp.ones((1, HID_CH), dtype=jnp.float32),
        "beta": jnp.zeros((1, HID_CH), dtype=jnp.float32),
    }

    # One-time parameter preparation (hoisted out of the per-call path).
    param_slab = prepare_param_slab(params)
    jax.block_until_ready(param_slab)

    # 1) Single graph -- exact semantics of the original module forward.
    out = gnn_forward(x, y, a_hat, param_slab)
    jax.block_until_ready(out)
    assert out.shape == (N, OUT_CH)

    # 2) Batched graphs: G=16 graphs, 8 graphs per grid step (M = 256 stacked node
    #    rows per weight matmul -> fills the v6e/v7x MXU), parallel grid axis of 2.
    G, GPB = 16, 8
    xb = jax.random.normal(ks[10], (G, NU, USER_FEAT), dtype=jnp.float32)
    yb = jax.random.normal(ks[11], (G, NM, MOVIE_FEAT), dtype=jnp.float32)
    zb = build_z_in(xb, yb)
    ab = jnp.broadcast_to(a_hat, (G, N, N))
    out_b = gnn_forward_batched(zb, ab, param_slab, graphs_per_block=GPB)
    jax.block_until_ready(out_b)
    assert out_b.shape == (G, N, OUT_CH)

    # TODO(synk): for sparse / very large graphs, replace the dense A_hat matmul
    # with a scalar-prefetched neighbor-gather kernel instead of densifying.
    print("KERNEL_OK")
</pallas_src>

<mosaic_0001>
module attributes {stable_mosaic.version = 11 : i64} {
  func.func @gnn_kernel(%arg0: i32, %arg1: memref<1x32x22xf32, #tpu.memory_space<vmem>>, %arg2: memref<1x32x32xf32, #tpu.memory_space<vmem>>, %arg3: memref<96x128xf32, #tpu.memory_space<vmem>>, %arg4: memref<1x32x128xf32, #tpu.memory_space<vmem>>) attributes {dimension_semantics = [#tpu.dimension_semantics<parallel>], iteration_bounds = array<i64: 1>, scalar_prefetch = 0 : i64, scratch_operands = 0 : i64, tpu.core_type = #tpu.core_type<tc>, window_params = [{transform_indices = @transform_0, window_bounds = array<i64: 1, 32, 22>}, {transform_indices = @transform_1, window_bounds = array<i64: 1, 32, 32>}, {pipeline_mode = #tpu.pipeline_mode<synchronous>, transform_indices = @transform_2, window_bounds = array<i64: 96, 128>}, {transform_indices = @transform_3, window_bounds = array<i64: 1, 32, 128>}]} {
    %c0 = arith.constant 0 : index
    %c0_0 = arith.constant 0 : index
    %0 = vector.load %arg3[%c0, %c0_0] : memref<96x128xf32, #tpu.memory_space<vmem>>, vector<22x32xf32>
    %c24 = arith.constant 24 : index
    %c0_1 = arith.constant 0 : index
    %1 = vector.load %arg3[%c24, %c0_1] : memref<96x128xf32, #tpu.memory_space<vmem>>, vector<32x32xf32>
    %c56 = arith.constant 56 : index
    %c0_2 = arith.constant 0 : index
    %2 = vector.load %arg3[%c56, %c0_2] : memref<96x128xf32, #tpu.memory_space<vmem>>, vector<32x128xf32>
    %c88 = arith.constant 88 : index
    %c0_3 = arith.constant 0 : index
    %3 = vector.load %arg3[%c88, %c0_3] : memref<96x128xf32, #tpu.memory_space<vmem>>, vector<1x32xf32>
    %c89 = arith.constant 89 : index
    %c0_4 = arith.constant 0 : index
    %4 = vector.load %arg3[%c89, %c0_4] : memref<96x128xf32, #tpu.memory_space<vmem>>, vector<1x32xf32>
    %c90 = arith.constant 90 : index
    %c0_5 = arith.constant 0 : index
    %5 = vector.load %arg3[%c90, %c0_5] : memref<96x128xf32, #tpu.memory_space<vmem>>, vector<1x128xf32>
    %c0_6 = arith.constant 0 : index
    %c0_7 = arith.constant 0 : index
    %c0_8 = arith.constant 0 : index
    %6 = vector.load %arg2[%c0_6, %c0_7, %c0_8] : memref<1x32x32xf32, #tpu.memory_space<vmem>>, vector<1x32x32xf32>
    %c0_9 = arith.constant 0 : index
    %c0_10 = arith.constant 0 : index
    %c0_11 = arith.constant 0 : index
    %7 = vector.load %arg1[%c0_9, %c0_10, %c0_11] : memref<1x32x22xf32, #tpu.memory_space<vmem>>, vector<1x32x22xf32>
    %8 = vector.shape_cast %7 : vector<1x32x22xf32> to vector<32x22xf32>
    %cst = arith.constant dense<0.000000e+00> : vector<32x32xf32>
    %9 = tpu.matmul %8, %0, %cst {dimension_numbers = #tpu.dot_dimension_numbers<[1], [0], [0], [1], [0, 0, 1, 1], [], []>} : vector<32x22xf32>, vector<22x32xf32>, vector<32x32xf32> -> vector<32x32xf32>
    %10 = vector.shape_cast %9 : vector<32x32xf32> to vector<1x32x32xf32>
    %11 = vector.shape_cast %1 : vector<32x32xf32> to vector<1x32x32xf32>
    %12 = arith.addf %10, %11 : vector<1x32x32xf32>
    "tpu.trace_start"() <{level = 10 : i32, message = "gij,gjk->gik"}> : () -> ()
    %cst_12 = arith.constant dense<0.000000e+00> : vector<1x32x32xf32>
    %13 = tpu.matmul %6, %12, %cst_12 {dimension_numbers = #tpu.dot_dimension_numbers<[2], [1], [1], [2], [0, 0, 0, 1, 1, 2], [0], [0]>} : vector<1x32x32xf32>, vector<1x32x32xf32>, vector<1x32x32xf32> -> vector<1x32x32xf32>
    "tpu.trace_stop"() : () -> ()
    %cst_13 = arith.constant dense<0.000000e+00> : vector<1x32xf32>
    %14 = vector.multi_reduction <add>, %13, %cst_13 [1] : vector<1x32x32xf32> to vector<1x32xf32>
    %15 = vector.shape_cast %14 : vector<1x32xf32> to vector<1x1x32xf32>
    %cst_14 = arith.constant 3.200000e+01 : f32
    %16 = vector.broadcast %cst_14 : f32 to vector<1x1x32xf32>
    %17 = arith.divf %15, %16 : vector<1x1x32xf32>
    %18 = vector.broadcast %17 : vector<1x1x32xf32> to vector<1x32x32xf32>
    %19 = arith.subf %13, %18 : vector<1x32x32xf32>
    %20 = arith.mulf %19, %19 : vector<1x32x32xf32>
    %cst_15 = arith.constant dense<0.000000e+00> : vector<1x32xf32>
    %21 = vector.multi_reduction <add>, %20, %cst_15 [1] : vector<1x32x32xf32> to vector<1x32xf32>
    %22 = vector.shape_cast %21 : vector<1x32xf32> to vector<1x1x32xf32>
    %cst_16 = arith.constant 3.200000e+01 : f32
    %23 = vector.broadcast %cst_16 : f32 to vector<1x1x32xf32>
    %24 = arith.divf %22, %23 : vector<1x1x32xf32>
    %cst_17 = arith.constant 9.99999974E-6 : f32
    %25 = vector.broadcast %cst_17 : f32 to vector<1x1x32xf32>
    %26 = arith.addf %24, %25 : vector<1x1x32xf32>
    %27 = math.rsqrt %26 : vector<1x1x32xf32>
    %28 = vector.broadcast %27 : vector<1x1x32xf32> to vector<1x32x32xf32>
    %29 = arith.mulf %19, %28 : vector<1x32x32xf32>
    %30 = vector.shape_cast %3 : vector<1x32xf32> to vector<1x1x32xf32>
    %31 = vector.broadcast %30 : vector<1x1x32xf32> to vector<1x32x32xf32>
    %32 = arith.mulf %29, %31 : vector<1x32x32xf32>
    %33 = vector.shape_cast %4 : vector<1x32xf32> to vector<1x1x32xf32>
    %34 = vector.broadcast %33 : vector<1x1x32xf32> to vector<1x32x32xf32>
    %35 = arith.addf %32, %34 : vector<1x32x32xf32>
    %cst_18 = arith.constant 0.000000e+00 : f32
    %36 = vector.broadcast %cst_18 : f32 to vector<1x32x32xf32>
    %37 = arith.maximumf %35, %36 : vector<1x32x32xf32>
    %38 = vector.shape_cast %37 : vector<1x32x32xf32> to vector<32x32xf32>
    %cst_19 = arith.constant dense<0.000000e+00> : vector<32x128xf32>
    %39 = tpu.matmul %38, %2, %cst_19 {dimension_numbers = #tpu.dot_dimension_numbers<[1], [0], [0], [1], [0, 0, 1, 1], [], []>} : vector<32x32xf32>, vector<32x128xf32>, vector<32x128xf32> -> vector<32x128xf32>
    %40 = vector.shape_cast %39 : vector<32x128xf32> to vector<1x32x128xf32>
    "tpu.trace_start"() <{level = 10 : i32, message = "gij,gjk->gik"}> : () -> ()
    %cst_20 = arith.constant dense<0.000000e+00> : vector<1x32x128xf32>
    %41 = tpu.matmul %6, %40, %cst_20 {dimension_numbers = #tpu.dot_dimension_numbers<[2], [1], [1], [2], [0, 0, 0, 1, 1, 2], [0], [0]>} : vector<1x32x32xf32>, vector<1x32x128xf32>, vector<1x32x128xf32> -> vector<1x32x128xf32>
    "tpu.trace_stop"() : () -> ()
    %42 = vector.shape_cast %5 : vector<1x128xf32> to vector<1x1x128xf32>
    %43 = vector.broadcast %42 : vector<1x1x128xf32> to vector<1x32x128xf32>
    %44 = arith.addf %41, %43 : vector<1x32x128xf32>
    %c0_21 = arith.constant 0 : index
    %c0_22 = arith.constant 0 : index
    %c0_23 = arith.constant 0 : index
    %45 = vector.load %arg4[%c0_21, %c0_22, %c0_23] : memref<1x32x128xf32, #tpu.memory_space<vmem>>, vector<1x32x128xf32>
    tpu.vector_store %arg4[%c0_21, %c0_22, %c0_23], %44 {strides = array<i32>} : memref<1x32x128xf32, #tpu.memory_space<vmem>>, vector<1x32x128xf32>,
    return
  }
  func.func @transform_0(%arg0: i32) -> (i32, i32, i32) {
    %c0_i32 = arith.constant 0 : i32
    %c0_i32_0 = arith.constant 0 : i32
    %c0_i32_1 = arith.constant 0 : i32
    return %arg0, %c0_i32, %c0_i32_0 : i32, i32, i32
  }
  func.func @transform_1(%arg0: i32) -> (i32, i32, i32) {
    %c0_i32 = arith.constant 0 : i32
    %c0_i32_0 = arith.constant 0 : i32
    %c0_i32_1 = arith.constant 0 : i32
    return %arg0, %c0_i32, %c0_i32_0 : i32, i32, i32
  }
  func.func @transform_2(%arg0: i32) -> (i32, i32) {
    %c0_i32 = arith.constant 0 : i32
    %c0_i32_0 = arith.constant 0 : i32
    %c0_i32_1 = arith.constant 0 : i32
    return %c0_i32, %c0_i32_0 : i32, i32
  }
  func.func @transform_3(%arg0: i32) -> (i32, i32, i32) {
    %c0_i32 = arith.constant 0 : i32
    %c0_i32_0 = arith.constant 0 : i32
    %c0_i32_1 = arith.constant 0 : i32
    return %arg0, %c0_i32, %c0_i32_0 : i32, i32, i32
  }
}

</mosaic_0001>

<bundles_post_ra>
// kernel: tpu_custom_call.1
= control target key start
LH: loop header
LB: loop body
LE: loop exit
PB: predicated region body
PF: predicated region fallthrough
CT: control target
= control target key end

     0   :  { %8 = vsyncpa [#allocation3], 0  ;;  %s826_s0 = inlined_call_operand.vmem [shape: f32[1,32,22], index: 0, kind: input, shape index: {}]   ;;  %s827_s1 = inlined_call_operand.vmem [shape: f32[1,32,32], index: 1, kind: input, shape index: {}]   ;;  %s828_s2 = inlined_call_operand.hbm [shape: f32[96,128], index: 2, kind: input, shape index: {}]   ;;  %s829_s3 = inlined_call_operand.hbm [shape: f32[1,32,128], index: 3, kind: output, shape index: {}]  }
   0x1   :  { %9 = vsyncpa [#allocation4], 0  ;;  %s712_s12 = smov [#allocation2]   ;;  %s664_s16 = scalar_lea.hbm %s828_s2, 1536 }
   0x2   :  { %s19_s13 = sshll.u32 %s712_s12, 4  ;;  %p665_p0 = scmp.ne.s32.totalorder %s828_s2, %s664_s16  ;;  %s20_s13 = int_to_ptr.vmem [resolvable:$true] %s19_s13 }
   0x3   :  { %p668_p1 = scmp.lt.u32.totalorder %s664_s16, %s828_s2 }
   0x5   :  { %p670_p2 = pnand %p668_p1, %p665_p0 }
   0x7   :  { %673 = shalt.err (!%p670_p2)
}
   0x8   :  { %s674_s21 = scalar_lea.vmem %s20_s13, 1536  ;;  %p679_p4 = scmp.lt.s32.totalorder %s20_s13, %s20_s13 }
   0x9   :  { %p675_p3 = scmp.ne.s32.totalorder %s20_s13, %s674_s21  ;;  %p680_p5 = scmp.lt.s32.totalorder %s674_s21, %s674_s21 }
   0xb   :  { %p681_p6 = por %p680_p5, %p679_p4 }
   0xd   :  { %p682_p7 = pnand %p681_p6, %p675_p3 }
   0xf   :  { %685 = shalt.err (!%p682_p7)
}
  0x10   :  { %s713_s22 = smov 128   ;;  %s714_s23 = smov 8  }
  0x11   :  { %25 = dma.hbm_to_vmem [thread:$0]  %s828_s2, 1536, %s20_s13, [#allocation3], %s713_s22, %s713_s22, %s714_s23  }
  0x12   :  { %708 = dma.done.wait [#allocation3], 1536  }
  0x13   :  { %709 = vsyncadd [#allocation3], 4294965760  ;;  %vm51_vm0 = vcmask 179200   ;;  %v29_v0 = vld [vmem:[#allocation2] sm:$0xff]  ;;  %v30_v1 = vld [vmem:[#allocation2 + $0x8] sm:$0xff]  ;;  %vm64_vm1 = vcmask 1045504  }
  0x14   :  { %v630_v2 = vpack.c.bf16 %v30_v1, %v29_v0  ;;  %v47_v3 = vld [vmem:[%s826_s0] sm:$0xff]  ;;  %v31_v4 = vld [vmem:[#allocation2 + $0x10] sm:$0x3f]  ;;  %v48_v5 = vld [vmem:[%s826_s0 + $0x8] sm:$0xff]  ;;  %vm157_vm2 = vcmask 261120  }
  0x15   :  { %582 = vmatprep.mubr.msk.f32.mxu0 %vm51_vm0, %v47_v3  ;;  %v49_v6 = vld [vmem:[%s826_s0 + $0x10] sm:$0xff]  ;;  %v50_v7 = vld [vmem:[%s826_s0 + $0x18] sm:$0xff]  ;;  %v43_v8 = vld [vmem:[%s827_s1] sm:$0xff] }
  0x16   :  { %631 = vmatprep.subr.bf16.mxu0 %v630_v2  ;;  %596 = vmatprep.mubr.msk.f32.mxu1 %vm157_vm2, %v43_v8  ;;  %v33_v9 = vld [vmem:[#allocation2 + $0x20] sm:$0xff]  ;;  %v32_v10 = vld [vmem:[#allocation2 + $0x18] sm:$0xff]  ;;  %v35_v15 = vld [vmem:[#allocation2 + $0x30] sm:$0xff] }
  0x17   :  { %633 = vmatpush3.bf16.msra.mxu0 %v630_v2  ;;  %v34_v16 = vld [vmem:[#allocation2 + $0x28] sm:$0xff]  ;;  %v779_v24 = vld [vmem:[%s827_s1 + $0x10] sm:$0xff]  ;;  %v788_v25 = vld [vmem:[%s827_s1 + $0x18] sm:$0xff] }
  0x18   :  { %580 = vmatprep.subr.msk.mxu0 %vm64_vm1, %v31_v4  ;;  %v774_v23 = vld [vmem:[%s827_s1 + $0x8] sm:$0xff]  ;;  %v36_v26 = vld [vmem:[#allocation2 + $0x38] sm:$0xff]  ;;  %v37_v27 = vld [vmem:[#allocation2 + $0x40] sm:$0xff]  ;;  %s715_s1 = smov [#allocation5]  }
  0x19   :  { %v642_v28 = vpack.c.bf16 %v37_v27, %v36_v26  ;;  %v38_v29 = vld [vmem:[#allocation2 + $0x48] sm:$0xff]  ;;  %v39_v30 = vld [vmem:[#allocation2 + $0x50] sm:$0xff]  ;;  %s513_s13 = sshll.u32 %s715_s1, 4  ;;  %s514_s13 = int_to_ptr.vmem [resolvable:$true] %s513_s13 }
  0x1a   :  { %v646_v31 = vpack.c.bf16 %v39_v30, %v38_v29  ;;  %s686_s14 = scalar_lea.vmem %s514_s13, 512  ;;  %p691_p9 = scmp.lt.s32.totalorder %s514_s13, %s514_s13 }
  0x1b   :  { %581 = vmatpush3.msk.msra.mxu0 %vm64_vm1, %v31_v4  ;;  %p687_p8 = scmp.ne.s32.totalorder %s514_s13, %s686_s14  ;;  %p692_p10 = scmp.lt.s32.totalorder %s686_s14, %s686_s14 }
  0x1c   :  { %583 = vmatmul.mubr.msk.f32.vlgmr.msra.gmra.mrb[0].mxu0 %vm51_vm0, %v48_v5  ;;  %643 = vmatprep.subr.bf16.mxu0 %v642_v28 }
  0x1d   :  { %585 = vmatprep.mubr.msk.f32.mxu0 %vm51_vm0, %v49_v6  ;;  %645 = vmatpush3.bf16.msra.mxu0 %v642_v28  ;;  %p693_p11 = por %p692_p10, %p691_p9 }
  0x1e   :  { %647 = vmatprep.subr.bf16.mxu0 %v646_v31 }
  0x1f   :  { %p694_p12 = pnand %p693_p11, %p687_p8 }
  0x20   :  { %586 = vmatmul.mubr.msk.f32.gmra.mrb[2].mxu0 %vm51_vm0, %v50_v7 }
  0x21   :  { %649 = vmatpush3.bf16.msra.mxu0 %v646_v31 }
  0xef   :  { %v584_v11 = vpop.f32.mrb[0].mxu0 }
  0xf0   :  { %v154_v12 = vadd.f32 %v584_v11, %v33_v9  ;;  %v134_v13 = vpop.f32.mrb[1].mxu0 }
  0xf1   :  { %v153_v14 = vadd.f32 %v134_v13, %v32_v10  ;;  %v534_v10 = vld [vmem:[#allocation2 + $0x58] ss:$0 sm:$0xff] }
  0xf3   :  { %v587_v17 = vpop.f32.mrb[2].mxu0  ;;  %v634_v18 = vpack.c.bf16 %v154_v12, %v153_v14 }
  0xf4   :  { %v156_v19 = vadd.f32 %v587_v17, %v35_v15  ;;  %v144_v20 = vpop.f32.mrb[3].mxu0  ;;  %v535_v15 = vld [vmem:[#allocation2 + $0x59] ss:$0 sm:$0xff] }
  0xf5   :  { %v155_v21 = vadd.f32 %v144_v20, %v34_v16  ;;  %635 = vmatprep.subr.bf16.mxu1 %v634_v18 }
  0xf6   :  { %637 = vmatpush3.bf16.msra.mxu1 %v634_v18 }
  0xf7   :  { %v638_v22 = vpack.c.bf16 %v156_v19, %v155_v21 }
  0xf9   :  { %639 = vmatprep.subr.bf16.mxu1 %v638_v22 }
  0xfa   :  { %641 = vmatpush3.bf16.msra.mxu1 %v638_v22 }
  0xfd   :  { %597 = vmatmul.mubr.msk.f32.vlgmr.msra.gmra.mrb[0].mxu1 %vm157_vm2, %v774_v23 }
  0xfe   :  { %599 = vmatprep.mubr.msk.f32.mxu1 %vm157_vm2, %v779_v24 }
 0x101   :  { %600 = vmatmul.mubr.msk.f32.gmra.mrb[2].mxu1 %vm157_vm2, %v788_v25 }
 0x102   :  { %624 = vmatprep.mubr.msk.f32.mxu1 %vm157_vm2, %v43_v8 }
 0x1d0   :  { %v598_v32 = vpop.f32.mrb[0].mxu1 }
 0x1d1   :  { %v256_v33 = vsel %vm157_vm2, %v598_v32, 0.0  ;;  %v236_v34 = vpop.f32.mrb[1].mxu1 }
 0x1d2   :  { %v255_v35 = vsel %vm157_vm2, %v236_v34, 0.0 }
 0x1d3   :  { %v257_v36 = vadd.f32 %v256_v33, %v255_v35 }
 0x1d4   :  { %v601_v37 = vpop.f32.mrb[2].mxu1 }
 0x1d5   :  { %v246_v38 = vpop.f32.mrb[3].mxu1  ;;  %v260_v41 = vsel %vm157_vm2, %v601_v37, 0.0 }
 0x1d6   :  { %v258_v39 = vsel %vm157_vm2, %v246_v38, 0.0 }
 0x1d7   :  { %v259_v40 = vadd.f32 %v258_v39, %v257_v36 }
 0x1d9   :  { %v261_v42 = vadd.f32 %v260_v41, %v259_v40 }
 0x1db   :  { %v262_v43 = vrot.slane %v261_v42, 4 }
 0x1dd   :  { %v263_v44 = vadd.f32 %v262_v43, %v261_v42 }
 0x1df   :  { %v264_v45 = vrot.slane %v263_v44, 2 }
 0x1e1   :  { %v265_v46 = vadd.f32 %v264_v45, %v263_v44 }
 0x1e3   :  { %v266_v47 = vrot.slane %v265_v46, 1 }
 0x1e5   :  { %v267_v48 = vadd.f32 %v266_v47, %v265_v46 }
 0x1e7   :  { %v269_v49 = vmul.f32 0.03125, %v267_v48 }
 0x1e9   :  { %v270_v50 = vsub.f32 %v236_v34, %v269_v49  ;;  %v271_v51 = vsub.f32 %v598_v32, %v269_v49  ;;  %v272_v52 = vsub.f32 %v246_v38, %v269_v49  ;;  %v273_v53 = vsub.f32 %v601_v37, %v269_v49  ;;  %v540_v37 = vld [vmem:[#allocation2 + $0x5a] ss:$0 sm:$0xff] }
 0x1eb   :  { %v274_v54 = vmul.f32 %v270_v50, %v270_v50  ;;  %v275_v55 = vmul.f32 %v271_v51, %v271_v51  ;;  %v276_v56 = vmul.f32 %v272_v52, %v272_v52  ;;  %v277_v57 = vmul.f32 %v273_v53, %v273_v53 }
 0x1ed   :  { %v278_v58 = vsel %vm157_vm2, %v274_v54, 0.0  ;;  %v279_v59 = vsel %vm157_vm2, %v275_v55, 0.0  ;;  %v281_v61 = vsel %vm157_vm2, %v276_v56, 0.0  ;;  %v283_v63 = vsel %vm157_vm2, %v277_v57, 0.0 }
 0x1ee   :  { %v280_v60 = vadd.f32 %v279_v59, %v278_v58 }
 0x1f0   :  { %v282_v62 = vadd.f32 %v281_v61, %v280_v60 }
 0x1f2   :  { %v284_v0 = vadd.f32 %v283_v63, %v282_v62 }
 0x1f4   :  { %v285_v1 = vrot.slane %v284_v0, 4 }
 0x1f6   :  { %v286_v2 = vadd.f32 %v285_v1, %v284_v0 }
 0x1f8   :  { %v287_v3 = vrot.slane %v286_v2, 2 }
 0x1fa   :  { %v288_v4 = vadd.f32 %v287_v3, %v286_v2 }
 0x1fc   :  { %v289_v5 = vrot.slane %v288_v4, 1 }
 0x1fe   :  { %v290_v6 = vadd.f32 %v289_v5, %v288_v4 }
 0x200   :  { %v291_v7 = vmul.f32 0.03125, %v290_v6 }
 0x202   :  { %v292_v8 = vadd.f32 1e-05, %v291_v7 }
 0x204   :  { %662 = vrsqrt.f32 %v292_v8 }
 0x20e   :  { %v663_v9 = vpop.eup %662 }
 0x20f   :  { %v295_v11 = vmul.f32 %v663_v9, %v271_v51  ;;  %v296_v12 = vmul.f32 %v663_v9, %v272_v52  ;;  %v294_v13 = vmul.f32 %v663_v9, %v270_v50  ;;  %v297_v14 = vmul.f32 %v663_v9, %v273_v53 }
 0x211   :  { %v303_v16 = vmul.f32 %v534_v10, %v295_v11  ;;  %v304_v17 = vmul.f32 %v534_v10, %v296_v12  ;;  %v302_v18 = vmul.f32 %v534_v10, %v294_v13  ;;  %v305_v19 = vmul.f32 %v534_v10, %v297_v14 }
 0x213   :  { %v311_v20 = vadd.f32 %v535_v15, %v303_v16  ;;  %v312_v21 = vadd.f32 %v535_v15, %v304_v17  ;;  %v310_v22 = vadd.f32 %v535_v15, %v302_v18  ;;  %v313_v28 = vadd.f32 %v535_v15, %v305_v19 }
 0x215   :  { %v315_v26 = vmax.f32 %v311_v20, 0.0  ;;  %v314_v27 = vmax.f32 %v310_v22, 0.0  ;;  %v316_v29 = vmax.f32 %v312_v21, 0.0  ;;  %v317_v30 = vmax.f32 %v313_v28, 0.0 }
 0x217   :  { %610 = vmatprep.mubr.msk.f32.mxu0 %vm157_vm2, %v314_v27 }
 0x218   :  { %611 = vmatmul.mubr.msk.f32.vlgmr.msra.gmra.mrb[4].mxu0 %vm157_vm2, %v315_v26 }
 0x219   :  { %613 = vmatprep.mubr.msk.f32.mxu0 %vm157_vm2, %v316_v29 }
 0x21c   :  { %614 = vmatmul.mubr.msk.f32.gmra.mrb[6].mxu0 %vm157_vm2, %v317_v30 }
 0x2eb   :  { %v612_v31 = vpop.f32.mrb[4].mxu0 }
 0x2ec   :  { %v396_v32 = vpop.f32.mrb[5].mxu0 }
 0x2ed   :  { %v650_v33 = vpack.c.bf16 %v612_v31, %v396_v32 }
 0x2ef   :  { %v615_v34 = vpop.f32.mrb[6].mxu0  ;;  %651 = vmatprep.subr.bf16.mxu1 %v650_v33 }
 0x2f0   :  { %v406_v35 = vpop.f32.mrb[7].mxu0  ;;  %653 = vmatpush3.bf16.msra.mxu1 %v650_v33 }
 0x2f1   :  { %v654_v36 = vpack.c.bf16 %v615_v34, %v406_v35 }
 0x2f3   :  { %655 = vmatprep.subr.bf16.mxu1 %v654_v36 }
 0x2f4   :  { %657 = vmatpush3.bf16.msra.mxu1 %v654_v36 }
 0x2f7   :  { %625 = vmatmul.mubr.msk.f32.vlgmr.msra.gmra.mrb[4].mxu1 %vm157_vm2, %v774_v23 }
 0x2f8   :  { %627 = vmatprep.mubr.msk.f32.mxu1 %vm157_vm2, %v779_v24 }
 0x2fb   :  { %628 = vmatmul.mubr.msk.f32.gmra.mrb[6].mxu1 %vm157_vm2, %v788_v25 }
 0x3ca   :  { %v626_v38 = vpop.f32.mrb[4].mxu1 }
 0x3cb   :  { %v491_v39 = vadd.f32 %v626_v38, %v540_v37  ;;  %v485_v40 = vpop.f32.mrb[5].mxu1 }
 0x3cc   :  { %v486_v41 = vadd.f32 %v540_v37, %v485_v40 }
 0x3cd   :  { %505 = vst [vmem:[#allocation5 + $0x8] sm:$0xff] %v491_v39 }
 0x3ce   :  { %504 = vst [vmem:[#allocation5] sm:$0xff] %v486_v41  ;;  %v629_v42 = vpop.f32.mrb[6].mxu1 }
 0x3cf   :  { %v501_v43 = vadd.f32 %v629_v42, %v540_v37  ;;  %v495_v44 = vpop.f32.mrb[7].mxu1 }
 0x3d0   :  { %v496_v45 = vadd.f32 %v540_v37, %v495_v44 }
 0x3d1   :  { %507 = vst [vmem:[#allocation5 + $0x18] sm:$0xff] %v501_v43 }
 0x3d2   :  { %506 = vst [vmem:[#allocation5 + $0x10] sm:$0xff] %v496_v45 }
 0x3d3   :  { %697 = shalt.err (!%p694_p12)
}
 0x3d4   :  { %s698_s17 = scalar_lea.hbm %s829_s3, 512 }
 0x3d5   :  { %p699_p13 = scmp.ne.s32.totalorder %s829_s3, %s698_s17  ;;  %p702_p0 = scmp.lt.u32.totalorder %s698_s17, %s829_s3 }
 0x3d7   :  { %p704_p1 = pnand %p702_p0, %p699_p13 }
 0x3d9   :  { %707 = shalt.err (!%p704_p1)
}
 0x3da   :  { %519 = dma.vmem_to_hbm [thread:$0]  %s514_s13, 512, %s829_s3, [#allocation4], %s713_s22, %s713_s22, %s714_s23  }
 0x3db   :  { %710 = dma.done.wait [#allocation4], 512  }
 0x3dc   :  { %711 = vsyncadd [#allocation4], 4294966784 }
 0x3dd   :  { %523 = vsyncpa [#allocation3], 1 }
 0x3de   :  { %524 = vsyncpa [#allocation4], 1 }

</bundles_post_ra>
